<compile_context>
chip_gen: v5e
topology: v5e:2x2
jax: 0.10.0
libtpu: 0.0.40
codegen_flags: <defaults>
</compile_context>

<pallas_src>
import jax
import jax.numpy as jnp
from jax.experimental import pallas as pl
from jax.experimental.pallas import tpu as pltpu

LANE = 128
SUBLANE = 8
MAX_TILE_ROWS = 4096   # (4096, 128) f32 tile = 2 MiB per input pipeline buffer
NSPLIT_MAX = 2         # v7x has 2 TensorCores; harmless (sequential) elsewhere


def _make_mse_kernel(rows: int, row_tile: int, inner: int, needs_mask: bool):
    """Sum-of-squared-differences partial sums into an (8, 128) f32 block."""
    groups = row_tile // SUBLANE

    def kernel(s_ref, t_ref, out_ref):
        i = pl.program_id(1)

        @pl.when(i == 0)
        def _():
            out_ref[...] = jnp.zeros_like(out_ref)

        d = s_ref[...].astype(jnp.float32) - t_ref[...].astype(jnp.float32)
        dd = d * d

        if needs_mask:
            # Statically known ragged tail: mask out rows past the real extent
            # of this (possibly partial / duplicated) block.  Garbage rows of a
            # partial block (and duplicated clamp blocks) are selected to zero.
            b = pl.program_id(0) * inner + i              # unclamped global block idx
            limit = jnp.clip(rows - b * row_tile, 0, row_tile)
            row_ids = jax.lax.broadcasted_iota(jnp.int32, (row_tile, LANE), 0)
            dd = jnp.where(row_ids < limit, dd, 0.0)

        # Fold (row_tile, 128) -> (8, 128): pure VPU vreg adds, no cross-lane work.
        # The (groups, 8, 128) reshape keeps the (8, 128) vreg tile intact, so it
        # is a layout no-op.
        out_ref[...] += dd.reshape(groups, SUBLANE, LANE).sum(axis=0)

    return kernel


def _mse_mean_pallas(s: jax.Array, t: jax.Array) -> jax.Array:
    """mean((s - t)^2) over all elements, via a Pallas TPU streaming reduction."""
    assert s.shape == t.shape, "student/teacher feature maps must match"
    n_elem = s.size
    assert n_elem > 0, "empty feature map"

    s_flat = s.reshape(-1)
    t_flat = t.reshape(-1)

    # Only if the element count is not lane-aligned do we pad the flat tail with
    # zeros (zeros contribute 0 to the SSD).  The common conv-feature-map case
    # streams straight from the caller's buffers with no copies.
    if n_elem % LANE != 0:
        pad = (-n_elem) % LANE
        s_flat = jnp.pad(s_flat, (0, pad))
        t_flat = jnp.pad(t_flat, (0, pad))

    rows = s_flat.size // LANE
    s2d = s_flat.reshape(rows, LANE)
    t2d = t_flat.reshape(rows, LANE)

    # Tiny inputs: round up to one (8, 128) sublane tile (negligible copy).
    if rows < SUBLANE:
        pad_r = SUBLANE - rows
        s2d = jnp.pad(s2d, ((0, pad_r), (0, 0)))
        t2d = jnp.pad(t2d, ((0, pad_r), (0, 0)))
        rows = SUBLANE

    row_tile = min(MAX_TILE_ROWS, (rows // SUBLANE) * SUBLANE)
    num_blocks = pl.cdiv(rows, row_tile)
    nsplit = min(NSPLIT_MAX, num_blocks)
    inner = pl.cdiv(num_blocks, nsplit)
    # Mask needed iff the (nsplit x inner) grid over-covers the real row extent
    # (partial last block and/or a duplicated clamp block).
    needs_mask = (nsplit * inner * row_tile) != rows

    def in_map(c, i):
        # Clamp so a duplicated trailing block (odd block count) re-reads a valid
        # block; its contribution is masked to zero in-kernel.
        return (jnp.minimum(c * inner + i, num_blocks - 1), 0)

    partials = pl.pallas_call(
        _make_mse_kernel(rows, row_tile, inner, needs_mask),
        out_shape=jax.ShapeDtypeStruct((nsplit * SUBLANE, LANE), jnp.float32),
        grid_spec=pltpu.PrefetchScalarGridSpec(
            num_scalar_prefetch=0,
            grid=(nsplit, inner),
            in_specs=[
                pl.BlockSpec((row_tile, LANE), in_map),
                pl.BlockSpec((row_tile, LANE), in_map),
            ],
            out_specs=pl.BlockSpec((SUBLANE, LANE), lambda c, i: (c, 0)),
        ),
        compiler_params=pltpu.CompilerParams(
            dimension_semantics=("parallel", "arbitrary"),
        ),
        cost_estimate=pl.CostEstimate(
            flops=3 * rows * LANE,
            transcendentals=0,
            bytes_accessed=2 * rows * LANE * s2d.dtype.itemsize,
        ),
    )(s2d, t2d)

    # Tiny final cross-lane reduce over <= 2*8*128 partials, done outside the
    # hot loop.  Mean uses the ORIGINAL element count.
    return jnp.sum(partials, dtype=jnp.float32) / jnp.float32(n_elem)


@jax.custom_vjp
def _mse_mean(s: jax.Array, t: jax.Array) -> jax.Array:
    return _mse_mean_pallas(s, t)


def _mse_mean_fwd(s, t):
    return _mse_mean_pallas(s, t), (s, t)


def _mse_mean_bwd(res, g):
    s, t = res
    coef = (2.0 / s.size) * g
    diff = s.astype(jnp.float32) - t.astype(jnp.float32)
    grad = coef * diff
    return grad.astype(s.dtype), (-grad).astype(t.dtype)


_mse_mean.defvjp(_mse_mean_fwd, _mse_mean_bwd)


def hint_kd_loss(fm_s_last: jax.Array, fm_t_last: jax.Array, weight: float = 1.0) -> jax.Array:
    """MSE(fm_s_last, fm_t_last) * weight; forward runs as a Pallas TPU kernel."""
    return _mse_mean(fm_s_last, fm_t_last) * jnp.float32(weight)


class HintKDLoss:
    """JAX/Pallas port of the PyTorch HintKDLoss module."""

    def __init__(self, weight: float = 1.0, **kwargs):
        self.weight = weight

    def __call__(self, pred_s=None, pred_t=None, fm_s=None, fm_t=None):
        assert len(fm_s) == len(fm_t), (
            "The number of feature maps from student and teacher must be the same"
        )
        # .detach() on the teacher map -> stop_gradient (no-op for forward value).
        return hint_kd_loss(fm_s[-1], jax.lax.stop_gradient(fm_t[-1]), self.weight)


if __name__ == "__main__":
    key = jax.random.PRNGKey(0)
    k1, k2, k3, k4 = jax.random.split(key, 4)

    # Small NCHW feature maps; the loss only looks at the last pair.
    fm_s = [
        jax.random.normal(k1, (2, 4, 8, 8), dtype=jnp.float32),
        jax.random.normal(k2, (2, 4, 16, 16), dtype=jnp.float32),
    ]
    fm_t = [
        jax.random.normal(k3, (2, 4, 8, 8), dtype=jnp.float32),
        jax.random.normal(k4, (2, 4, 16, 16), dtype=jnp.float32),
    ]

    loss_mod = HintKDLoss(weight=1.0)
    loss = jax.block_until_ready(loss_mod(fm_s=fm_s, fm_t=fm_t))
    ref = jnp.mean((fm_s[-1] - fm_t[-1]) ** 2)
    assert jnp.allclose(loss, ref, rtol=1e-5, atol=1e-6), (loss, ref)

    # Multi-block / two-core-split path (rows > one tile).
    ks1, ks2 = jax.random.split(k1)
    big_s = jax.random.normal(ks1, (8, 16, 64, 64), dtype=jnp.float32)
    big_t = jax.random.normal(ks2, (8, 16, 64, 64), dtype=jnp.float32)
    loss_big = jax.block_until_ready(hint_kd_loss(big_s, big_t, 0.7))
    ref_big = jnp.mean((big_s - big_t) ** 2) * 0.7
    assert jnp.allclose(loss_big, ref_big, rtol=1e-4, atol=1e-6), (loss_big, ref_big)

    # Ragged path (element count not a multiple of 128 -> masked last block).
    kr1, kr2 = jax.random.split(k2)
    rag_s = jax.random.normal(kr1, (3, 5, 7, 11), dtype=jnp.float32)
    rag_t = jax.random.normal(kr2, (3, 5, 7, 11), dtype=jnp.float32)
    loss_rag = jax.block_until_ready(hint_kd_loss(rag_s, rag_t, 1.3))
    ref_rag = jnp.mean((rag_s - rag_t) ** 2) * 1.3
    assert jnp.allclose(loss_rag, ref_rag, rtol=1e-5, atol=1e-6), (loss_rag, ref_rag)

    # Partial-last-block path (lane-aligned but not a multiple of the row tile).
    kp1, kp2 = jax.random.split(k3)
    par_s = jax.random.normal(kp1, (3, 4, 10, 128), dtype=jnp.float32)   # 120 rows
    par_t = jax.random.normal(kp2, (3, 4, 10, 128), dtype=jnp.float32)
    loss_par = jax.block_until_ready(hint_kd_loss(par_s, par_t, 1.0))
    ref_par = jnp.mean((par_s - par_t) ** 2)
    assert jnp.allclose(loss_par, ref_par, rtol=1e-5, atol=1e-6), (loss_par, ref_par)

    # Gradient path (analytic custom_vjp backward).
    w = 0.5
    g = jax.grad(lambda s: hint_kd_loss(s, fm_t[-1], w))(fm_s[-1])
    g_ref = 2.0 * w / fm_s[-1].size * (fm_s[-1] - fm_t[-1])
    assert jnp.allclose(g, g_ref, rtol=1e-5, atol=1e-7), "grad mismatch"

    print("KERNEL_OK")
</pallas_src>

<mosaic_0001>
module attributes {stable_mosaic.version = 11 : i64} {
  func.func @kernel(%arg0: i32, %arg1: i32, %arg2: memref<16x128xf32, #tpu.memory_space<vmem>>, %arg3: memref<16x128xf32, #tpu.memory_space<vmem>>, %arg4: memref<8x128xf32, #tpu.memory_space<vmem>>) attributes {dimension_semantics = [#tpu.dimension_semantics<parallel>, #tpu.dimension_semantics<arbitrary>], iteration_bounds = array<i64: 1, 1>, scalar_prefetch = 0 : i64, scratch_operands = 0 : i64, tpu.core_type = #tpu.core_type<tc>, window_params = [{transform_indices = @transform_0, window_bounds = array<i64: 16, 128>}, {transform_indices = @transform_1, window_bounds = array<i64: 16, 128>}, {transform_indices = @transform_2, window_bounds = array<i64: 8, 128>}]} {
    %c0_i32 = arith.constant 0 : i32
    %0 = arith.cmpi eq, %arg1, %c0_i32 : i32
    %1 = arith.extui %0 : i1 to i32
    %c0_i32_0 = arith.constant 0 : i32
    %2 = arith.cmpi ne, %1, %c0_i32_0 : i32
    scf.if %2 {
      %cst_8 = arith.constant 0.000000e+00 : f32
      %12 = vector.broadcast %cst_8 : f32 to vector<8x128xf32>
      %c0_9 = arith.constant 0 : index
      %c0_10 = arith.constant 0 : index
      %13 = vector.load %arg4[%c0_9, %c0_10] : memref<8x128xf32, #tpu.memory_space<vmem>>, vector<8x128xf32>
      tpu.vector_store %arg4[%c0_9, %c0_10], %12 {strides = array<i32>} : memref<8x128xf32, #tpu.memory_space<vmem>>, vector<8x128xf32>,
    } else {
    }
    %c0 = arith.constant 0 : index
    %c0_1 = arith.constant 0 : index
    %3 = vector.load %arg2[%c0, %c0_1] : memref<16x128xf32, #tpu.memory_space<vmem>>, vector<16x128xf32>
    %c0_2 = arith.constant 0 : index
    %c0_3 = arith.constant 0 : index
    %4 = vector.load %arg3[%c0_2, %c0_3] : memref<16x128xf32, #tpu.memory_space<vmem>>, vector<16x128xf32>
    %5 = arith.subf %3, %4 : vector<16x128xf32>
    %6 = arith.mulf %5, %5 : vector<16x128xf32>
    %c0_4 = arith.constant 0 : index
    %c0_5 = arith.constant 0 : index
    %7 = vector.load %arg4[%c0_4, %c0_5] : memref<8x128xf32, #tpu.memory_space<vmem>>, vector<8x128xf32>
    %8 = vector.shape_cast %6 : vector<16x128xf32> to vector<2x8x128xf32>
    %cst = arith.constant dense<0.000000e+00> : vector<8x128xf32>
    %9 = vector.multi_reduction <add>, %8, %cst [0] : vector<2x8x128xf32> to vector<8x128xf32>
    %10 = arith.addf %7, %9 : vector<8x128xf32>
    %c0_6 = arith.constant 0 : index
    %c0_7 = arith.constant 0 : index
    %11 = vector.load %arg4[%c0_6, %c0_7] : memref<8x128xf32, #tpu.memory_space<vmem>>, vector<8x128xf32>
    tpu.vector_store %arg4[%c0_6, %c0_7], %10 {strides = array<i32>} : memref<8x128xf32, #tpu.memory_space<vmem>>, vector<8x128xf32>,
    return
  }
  func.func @transform_0(%arg0: i32, %arg1: i32) -> (i32, i32) {
    %c1_i32 = arith.constant 1 : i32
    %0 = arith.muli %arg0, %c1_i32 : i32
    %1 = arith.addi %0, %arg1 : i32
    %c0_i32 = arith.constant 0 : i32
    %2 = arith.minsi %1, %c0_i32 : i32
    %c0_i32_0 = arith.constant 0 : i32
    %c0_i32_1 = arith.constant 0 : i32
    return %2, %c0_i32_0 : i32, i32
  }
  func.func @transform_1(%arg0: i32, %arg1: i32) -> (i32, i32) {
    %c1_i32 = arith.constant 1 : i32
    %0 = arith.muli %arg0, %c1_i32 : i32
    %1 = arith.addi %0, %arg1 : i32
    %c0_i32 = arith.constant 0 : i32
    %2 = arith.minsi %1, %c0_i32 : i32
    %c0_i32_0 = arith.constant 0 : i32
    %c0_i32_1 = arith.constant 0 : i32
    return %2, %c0_i32_0 : i32, i32
  }
  func.func @transform_2(%arg0: i32, %arg1: i32) -> (i32, i32) {
    %c0_i32 = arith.constant 0 : i32
    %c0_i32_0 = arith.constant 0 : i32
    return %arg0, %c0_i32 : i32, i32
  }
}

</mosaic_0001>

<bundles_post_ra>
// kernel: tpu_custom_call.1
= control target key start
LH: loop header
LB: loop body
LE: loop exit
PB: predicated region body
PF: predicated region fallthrough
CT: control target
= control target key end

     0   :  { %7 = vsyncpa [#allocation3], 0  ;;  %s216_s0 = inlined_call_operand.hbm [shape: f32[16,128], index: 0, kind: input, shape index: {}]   ;;  %s217_s1 = inlined_call_operand.hbm [shape: f32[16,128], index: 1, kind: input, shape index: {}]   ;;  %s218_s2 = inlined_call_operand.hbm [shape: f32[8,128], index: 2, kind: output, shape index: {}]  }
   0x1   :  { %8 = vsyncpa [#allocation6], 0 }
   0x2   :  { %9 = vsyncpa [#allocation4], 0  ;;  %s20_s11 = sshll.u32 %s216_s0, 4  ;;  %s187_s12 = smov [#allocation2]   ;;  %s21_s11 = int_to_ptr.hbm [resolvable:$true] %s20_s11 }
   0x3   :  { %s22_s13 = sshll.u32 %s187_s12, 4  ;;  %s39_s16 = sshll.u32 %s217_s1, 4  ;;  %s23_s13 = int_to_ptr.vmem [resolvable:$true] %s22_s13  ;;  %s40_s16 = int_to_ptr.hbm [resolvable:$true] %s39_s16 }
   0x4   :  { %s188_s17 = smov 128   ;;  %s189_s18 = smov 8  }
   0x5   :  { %28 = dma.hbm_to_vmem [thread:$0]  %s21_s11, 256, %s23_s13, [#allocation3], %s188_s17, %s188_s17, %s189_s18  }
   0x6   :  { %s190_s19 = smov [#allocation5]  }
   0x7   :  { %s41_s20 = sshll.u32 %s190_s19, 4  ;;  %s42_s20 = int_to_ptr.vmem [resolvable:$true] %s41_s20 }
   0x8   :  { %47 = dma.hbm_to_vmem [thread:$0]  %s40_s16, 256, %s42_s20, [#allocation6], %s188_s17, %s188_s17, %s189_s18  }
   0x9   :  { %181 = dma.done.wait [#allocation3], 256  }
   0xa   :  { %182 = vsyncadd [#allocation3], 4294967040 }
   0xb   :  { %183 = dma.done.wait [#allocation6], 256  }
   0xc   :  { %184 = vsyncadd [#allocation6], 4294967040  ;;  %v69_v0 = vld [vmem:[#allocation2] sm:$0xff]  ;;  %v70_v1 = vld [vmem:[#allocation2 + $0x8] sm:$0xff]  ;;  %s191_s0 = smov [#allocation7]   ;;  %s88_s23 = sshll.u32 %s218_s2, 4  ;;  %s89_s23 = int_to_ptr.hbm [resolvable:$true] %s88_s23 }
   0xd   :  { %v71_v2 = vld [vmem:[#allocation5] sm:$0xff]  ;;  %v72_v3 = vld [vmem:[#allocation5 + $0x8] sm:$0xff]  ;;  %s86_s1 = sshll.u32 %s191_s0, 4  ;;  %s87_s1 = int_to_ptr.vmem [resolvable:$true] %s86_s1 }
   0xe   :  { %v73_v4 = vsub.f32 %v69_v0, %v71_v2  ;;  %v74_v5 = vsub.f32 %v70_v1, %v72_v3 }
  0x10   :  { %v75_v6 = vmul.f32 %v73_v4, %v73_v4  ;;  %v76_v7 = vmul.f32 %v74_v5, %v74_v5 }
  0x12   :  { %v78_v8 = vadd.f32 %v76_v7, %v75_v6 }
  0x14   :  { %80 = vst [vmem:[#allocation7] sm:$0xff] %v78_v8 }
  0x15   :  { %91 = dma.vmem_to_hbm [thread:$0]  %s87_s1, 128, %s89_s23, [#allocation4]  }
  0x16   :  { %185 = dma.done.wait [#allocation4], 128  }
  0x17   :  { %186 = vsyncadd [#allocation4], 4294967168 }
  0x18   :  { %96 = vsyncpa [#allocation3], 1 }
  0x19   :  { %97 = vsyncpa [#allocation6], 1 }
  0x1a   :  { %98 = vsyncpa [#allocation4], 1 }

</bundles_post_ra>
